<compile_context>
chip_gen: v7x
topology: tpu7x:2x2x1
jax: 0.10.0
libtpu: 0.0.40
codegen_flags: <defaults>
</compile_context>

<pallas_src>
import functools
import math

import numpy as np
import jax
import jax.numpy as jnp
from jax.experimental import pallas as pl
from jax.experimental.pallas import tpu as pltpu


def _round_up(x, m):
    return ((x + m - 1) // m) * m


def _vmf_logits_kernel(s_ref, wt_ref, o_ref, *, scale, k, num_classes,
                       mask_classes):
    """One batch tile: cosine matmul -> scaled softmax over classes ->
    mean over the k vMF draws -> log."""
    s = s_ref[...]                                   # (TR, Dp)  bf16, unit rows
    wt = wt_ref[...]                                 # (Dp, Cp)  bf16, unit cols

    # MXU hot path: bf16 x bf16 with f32 accumulation.  Weight is already
    # normalized + transposed (D, C) in the wrapper, so no per-step transpose
    # and no class-constant recompute here.
    scores = jnp.dot(s, wt, preferred_element_type=jnp.float32) * scale  # (TR, Cp)

    if mask_classes:                                 # zero-padded class columns
        cls = jax.lax.broadcasted_iota(jnp.int32, scores.shape, 1)
        scores = jnp.where(cls < num_classes, scores, jnp.float32(-1e30))

    # Softmax over classes for every sample draw (row).
    m = jnp.max(scores, axis=-1, keepdims=True)
    e = jnp.exp(scores - m)
    probs = e / jnp.sum(e, axis=-1, keepdims=True)   # (TR, Cp)

    # Mean over the k draws of each batch element via a tiny block-diagonal
    # averaging matmul (avoids sublane-splitting reshapes when k % 8 != 0).
    tr, _ = probs.shape
    tb = tr // k
    col = jax.lax.broadcasted_iota(jnp.int32, (tb, tr), 1)
    row = jax.lax.broadcasted_iota(jnp.int32, (tb, tr), 0)
    in_group = (col >= row * k) & (col < (row + 1) * k)
    avg = jnp.where(in_group, jnp.float32(1.0 / k), jnp.float32(0.0))
    mean_probs = jnp.dot(avg, probs, preferred_element_type=jnp.float32)  # (TB, Cp)

    o_ref[...] = jnp.log(mean_probs).astype(o_ref.dtype)


def _vmf_logits_from_samples(sample, weight, scale, *, tile_b=None):
    """Pallas forward on pre-drawn vMF samples.

    sample: (B, k, D) raw draws;  weight: (C, D) class prototypes;
    returns (B, C) log of the mean softmax probabilities.
    """
    B, k, D = sample.shape
    C, Dw = weight.shape
    assert D == Dw, "embedding dim mismatch"

    # ---- hoisted preprocessing: once per call, never per grid step ----------
    s = sample.reshape(B * k, D)
    s = s / (jnp.linalg.norm(s, axis=-1, keepdims=True) + 1e-12)      # F.normalize
    w = weight / (jnp.linalg.norm(weight, axis=-1, keepdims=True) + 1e-12)

    Dp = _round_up(D, 128)        # lane-align the contraction dim
    Cp = _round_up(C, 128)        # lane-dense output -> unmasked stores

    # ---- batch tiling: ~256 sample rows per grid step ------------------------
    if tile_b is None:
        tile_b = max(1, 256 // k)
    tile_b = min(int(tile_b), B)
    if tile_b < B and tile_b % 8 != 0:
        tile_b = max(8, (tile_b // 8) * 8)           # keep (8,128) block legality
    Bp = _round_up(B, tile_b)
    TR = tile_b * k

    # bf16 operands into the MXU (halves HBM traffic, f32 accumulation in kernel).
    s_p = jnp.pad(s, ((0, Bp * k - B * k), (0, Dp - D))).astype(jnp.bfloat16)
    wt_p = jnp.pad(w.T, ((0, Dp - D), (0, Cp - C))).astype(jnp.bfloat16)

    kernel = functools.partial(
        _vmf_logits_kernel, scale=float(scale), k=k, num_classes=C,
        mask_classes=(Cp != C))

    # TODO(synk): for very large C (weight tile > ~16 MiB bf16 on v7x's 64 MiB VMEM) add a class grid axis with an online-softmax accumulator instead of a fully resident weight.
    logits = pl.pallas_call(
        kernel,
        out_shape=jax.ShapeDtypeStruct((Bp, Cp), jnp.float32),
        grid_spec=pltpu.PrefetchScalarGridSpec(
            num_scalar_prefetch=0,
            grid=(Bp // tile_b,),
            in_specs=[
                pl.BlockSpec((TR, Dp), lambda i: (i, 0)),    # sample rows tile
                pl.BlockSpec((Dp, Cp), lambda i: (0, 0)),    # resident weight
            ],
            out_specs=pl.BlockSpec((tile_b, Cp), lambda i: (i, 0)),
        ),
        compiler_params=pltpu.CompilerParams(
            dimension_semantics=("parallel",)),
    )(s_p, wt_p)

    return logits[:B, :C]


def _approx_vmf_sample(parameters, k, key, kappa=50.0):
    # TODO(synk): exact vMF sampling (Wood's rejection algorithm) has no clean Pallas equivalent; use a tangent-space Gaussian approximation around the mean direction.
    B, D = parameters.shape
    mean_dir = parameters / (jnp.linalg.norm(parameters, axis=-1,
                                             keepdims=True) + 1e-12)
    noise = jax.random.normal(key, (B, k, D), dtype=jnp.float32) / math.sqrt(kappa)
    return mean_dir[:, None, :] + noise


def vmf_classifier_forward(parameters, weight, log_scale, *, sample_size=10,
                           key=None, tile_b=None):
    """VMFClassifier.forward for labels=None, deterministic_target=True."""
    # TODO(synk): the labels-given training branches (approximate logmls + scatter_ of -losses) and sampled targets (deterministic_target=False) are not implemented.
    if key is None:
        key = jax.random.PRNGKey(0)
    scale = math.exp(float(log_scale))          # 'trainable' scale = exp(log_scale)
    sample = _approx_vmf_sample(parameters, int(sample_size), key)
    return _vmf_logits_from_samples(sample, weight, scale, tile_b=tile_b)


def _reference_from_samples(sample, weight, scale):
    """Pure-JAX mirror of the torch inference branch, evaluated on the same
    bf16 operands the kernel consumes (isolates kernel numerics)."""
    B, k, D = sample.shape
    C = weight.shape[0]
    s = sample.reshape(B * k, D)
    s = s / (jnp.linalg.norm(s, axis=-1, keepdims=True) + 1e-12)
    w = weight / (jnp.linalg.norm(weight, axis=-1, keepdims=True) + 1e-12)
    s = s.astype(jnp.bfloat16).astype(jnp.float32)
    w = w.astype(jnp.bfloat16).astype(jnp.float32)
    scores = scale * (s @ w.T)                       # (B*k, C)
    probs = jax.nn.softmax(scores, axis=-1)
    probs = probs.reshape(B, k, C).mean(axis=1)      # mean over the k draws
    return jnp.log(probs)


if __name__ == "__main__":
    key = jax.random.PRNGKey(0)
    k_param, k_w, k_s = jax.random.split(key, 3)

    B = 2            # batch
    D = 32           # vMF distribution dim
    C = 16           # num_classes
    K = 10           # config: sample_size
    log_scale = 2.773          # config: initial_log_scale ('trainable' scale)
    lconf = 0.7                # config: kappa_confidence (weight init scale)

    parameters = jax.random.normal(k_param, (B, D), dtype=jnp.float32)
    w_std = lconf / (1.0 - lconf * lconf) * (D - 1) / math.sqrt(D)
    weight = w_std * jax.random.normal(k_w, (C, D), dtype=jnp.float32)

    # Draw the vMF samples once so kernel and reference see identical inputs.
    sample = _approx_vmf_sample(parameters, K, k_s)
    scale = math.exp(log_scale)

    out = _vmf_logits_from_samples(sample, weight, scale)
    out = jax.block_until_ready(out)

    ref = _reference_from_samples(sample, weight, scale)
    np.testing.assert_allclose(np.asarray(out), np.asarray(ref),
                               rtol=1e-4, atol=1e-4)

    # Also exercise the full forward wrapper (sampling included).
    full = jax.block_until_ready(
        vmf_classifier_forward(parameters, weight, log_scale,
                               sample_size=K, key=k_s))
    np.testing.assert_allclose(np.asarray(full), np.asarray(out),
                               rtol=1e-4, atol=1e-4)

    print("KERNEL_OK")
</pallas_src>

<mosaic_0001>
module attributes {stable_mosaic.version = 11 : i64} {
  func.func @_vmf_logits_kernel(%arg0: i32, %arg1: memref<20x128xbf16, #tpu.memory_space<vmem>>, %arg2: memref<128x128xbf16, #tpu.memory_space<vmem>>, %arg3: memref<2x128xf32, #tpu.memory_space<vmem>>) attributes {dimension_semantics = [#tpu.dimension_semantics<parallel>], iteration_bounds = array<i64: 1>, scalar_prefetch = 0 : i64, scratch_operands = 0 : i64, tpu.core_type = #tpu.core_type<tc>, window_params = [{transform_indices = @transform_0, window_bounds = array<i64: 20, 128>}, {pipeline_mode = #tpu.pipeline_mode<synchronous>, transform_indices = @transform_1, window_bounds = array<i64: 128, 128>}, {transform_indices = @transform_2, window_bounds = array<i64: 2, 128>}]} {
    %c0 = arith.constant 0 : index
    %c0_0 = arith.constant 0 : index
    %0 = vector.load %arg1[%c0, %c0_0] : memref<20x128xbf16, #tpu.memory_space<vmem>>, vector<20x128xbf16>
    %c0_1 = arith.constant 0 : index
    %c0_2 = arith.constant 0 : index
    %1 = vector.load %arg2[%c0_1, %c0_2] : memref<128x128xbf16, #tpu.memory_space<vmem>>, vector<128x128xbf16>
    %cst = arith.constant dense<0.000000e+00> : vector<20x128xf32>
    %2 = tpu.matmul %0, %1, %cst {dimension_numbers = #tpu.dot_dimension_numbers<[1], [0], [0], [1], [0, 0, 1, 1], [], []>} : vector<20x128xbf16>, vector<128x128xbf16>, vector<20x128xf32> -> vector<20x128xf32>
    %cst_3 = arith.constant 16.0065823 : f32
    %3 = vector.broadcast %cst_3 : f32 to vector<20x128xf32>
    %4 = arith.mulf %2, %3 : vector<20x128xf32>
    %5 = tpu.iota {dimensions = array<i32: 1>} : vector<20x128xi32>
    %c16_i32 = arith.constant 16 : i32
    %6 = vector.broadcast %c16_i32 : i32 to vector<20x128xi32>
    %7 = arith.cmpi slt, %5, %6 : vector<20x128xi32>
    %cst_4 = arith.constant -1.000000e+30 : f32
    %8 = vector.broadcast %cst_4 : f32 to vector<20x128xf32>
    %9 = arith.select %7, %4, %8 : vector<20x128xi1>, vector<20x128xf32>
    %cst_5 = arith.constant dense<0xFF800000> : vector<20xf32>
    %10 = vector.multi_reduction <maximumf>, %9, %cst_5 [1] : vector<20x128xf32> to vector<20xf32>
    %11 = vector.shape_cast %10 : vector<20xf32> to vector<20x1xf32>
    %12 = vector.broadcast %11 : vector<20x1xf32> to vector<20x128xf32>
    %13 = arith.subf %9, %12 : vector<20x128xf32>
    %14 = math.exp %13 : vector<20x128xf32>
    %cst_6 = arith.constant dense<0.000000e+00> : vector<20xf32>
    %15 = vector.multi_reduction <add>, %14, %cst_6 [1] : vector<20x128xf32> to vector<20xf32>
    %16 = vector.shape_cast %15 : vector<20xf32> to vector<20x1xf32>
    %17 = vector.broadcast %16 : vector<20x1xf32> to vector<20x128xf32>
    %18 = arith.divf %14, %17 : vector<20x128xf32>
    %19 = tpu.iota {dimensions = array<i32: 1>} : vector<2x20xi32>
    %20 = tpu.iota {dimensions = array<i32: 0>} : vector<2x20xi32>
    %c10_i32 = arith.constant 10 : i32
    %21 = vector.broadcast %c10_i32 : i32 to vector<2x20xi32>
    %22 = arith.muli %20, %21 : vector<2x20xi32>
    %23 = arith.cmpi sge, %19, %22 : vector<2x20xi32>
    %c1_i32 = arith.constant 1 : i32
    %24 = vector.broadcast %c1_i32 : i32 to vector<2x20xi32>
    %25 = arith.addi %20, %24 : vector<2x20xi32>
    %c10_i32_7 = arith.constant 10 : i32
    %26 = vector.broadcast %c10_i32_7 : i32 to vector<2x20xi32>
    %27 = arith.muli %25, %26 : vector<2x20xi32>
    %28 = arith.cmpi slt, %19, %27 : vector<2x20xi32>
    %29 = arith.andi %23, %28 : vector<2x20xi1>
    %cst_8 = arith.constant 1.000000e-01 : f32
    %cst_9 = arith.constant 0.000000e+00 : f32
    %30 = vector.broadcast %cst_8 : f32 to vector<2x20xf32>
    %31 = vector.broadcast %cst_9 : f32 to vector<2x20xf32>
    %32 = arith.select %29, %30, %31 : vector<2x20xi1>, vector<2x20xf32>
    %cst_10 = arith.constant dense<0.000000e+00> : vector<2x128xf32>
    %33 = tpu.matmul %32, %18, %cst_10 {dimension_numbers = #tpu.dot_dimension_numbers<[1], [0], [0], [1], [0, 0, 1, 1], [], []>} : vector<2x20xf32>, vector<20x128xf32>, vector<2x128xf32> -> vector<2x128xf32>
    %34 = math.log %33 : vector<2x128xf32>
    %c0_11 = arith.constant 0 : index
    %c0_12 = arith.constant 0 : index
    %35 = vector.load %arg3[%c0_11, %c0_12] : memref<2x128xf32, #tpu.memory_space<vmem>>, vector<2x128xf32>
    tpu.vector_store %arg3[%c0_11, %c0_12], %34 {strides = array<i32>} : memref<2x128xf32, #tpu.memory_space<vmem>>, vector<2x128xf32>,
    return
  }
  func.func @transform_0(%arg0: i32) -> (i32, i32) {
    %c0_i32 = arith.constant 0 : i32
    %c0_i32_0 = arith.constant 0 : i32
    return %arg0, %c0_i32 : i32, i32
  }
  func.func @transform_1(%arg0: i32) -> (i32, i32) {
    %c0_i32 = arith.constant 0 : i32
    %c0_i32_0 = arith.constant 0 : i32
    %c0_i32_1 = arith.constant 0 : i32
    return %c0_i32, %c0_i32_0 : i32, i32
  }
  func.func @transform_2(%arg0: i32) -> (i32, i32) {
    %c0_i32 = arith.constant 0 : i32
    %c0_i32_0 = arith.constant 0 : i32
    return %arg0, %c0_i32 : i32, i32
  }
}

</mosaic_0001>

<bundles_post_ra>
// kernel: tpu_custom_call.1
= control target key start
LH: loop header
LB: loop body
LE: loop exit
PB: predicated region body
PF: predicated region fallthrough
CT: control target
= control target key end

     0   :  { %7 = vsyncpa [#allocation3], 0  ;;  %s534_s0 = inlined_call_operand.hbm [shape: bf16[20,128], index: 0, kind: input, shape index: {}]   ;;  %s535_s1 = inlined_call_operand.hbm [shape: bf16[128,128], index: 1, kind: input, shape index: {}]   ;;  %s536_s2 = inlined_call_operand.hbm [shape: f32[2,128], index: 2, kind: output, shape index: {}]  }
   0x1   :  { %8 = vsyncpa [#allocation6], 0 }
   0x2   :  { %9 = vsyncpa [#allocation4], 0  ;;  %s472_s9 = smov [#allocation2]   ;;  %s400_s13 = scalar_lea.hbm %s534_s0, 192 }
   0x3   :  { %s15_s10 = sshll.u32 %s472_s9, 4  ;;  %p401_p0 = scmp.ne.s32.totalorder %s534_s0, %s400_s13  ;;  %s16_s10 = int_to_ptr.vmem [resolvable:$true] %s15_s10 }
   0x4   :  { %p404_p1 = scmp.lt.u32.totalorder %s400_s13, %s534_s0 }
   0x6   :  { %p406_p2 = pnand %p404_p1, %p401_p0 }
   0x8   :  { %409 = shalt.err (!%p406_p2)
}
   0x9   :  { %s410_s18 = scalar_lea.vmem %s16_s10, 192  ;;  %p415_p4 = scmp.lt.s32.totalorder %s16_s10, %s16_s10 }
   0xa   :  { %p411_p3 = scmp.ne.s32.totalorder %s16_s10, %s410_s18  ;;  %p416_p5 = scmp.lt.s32.totalorder %s410_s18, %s410_s18 }
   0xc   :  { %p417_p6 = por %p416_p5, %p415_p4 }
   0xe   :  { %p418_p7 = pnand %p417_p6, %p411_p3 }
  0x10   :  { %421 = shalt.err (!%p418_p7)
}
  0x11   :  { %s473_s19 = smov 64   ;;  %s474_s20 = smov 4  }
  0x12   :  { %21 = dma.hbm_to_vmem [thread:$0]  %s534_s0, 192, %s16_s10, [#allocation3], %s473_s19, %s473_s19, %s474_s20  }
  0x13   :  { %s475_s23 = smov [#allocation5]   ;;  %s422_s27 = scalar_lea.hbm %s535_s1, 1024 }
  0x14   :  { %s27_s24 = sshll.u32 %s475_s23, 4  ;;  %p423_p8 = scmp.ne.s32.totalorder %s535_s1, %s422_s27  ;;  %s28_s24 = int_to_ptr.vmem [resolvable:$true] %s27_s24 }
  0x15   :  { %p426_p9 = scmp.lt.u32.totalorder %s422_s27, %s535_s1 }
  0x17   :  { %p428_p10 = pnand %p426_p9, %p423_p8 }
  0x19   :  { %431 = shalt.err (!%p428_p10)
}
  0x1a   :  { %s432_s4 = scalar_lea.vmem %s28_s24, 1024  ;;  %p437_p12 = scmp.lt.s32.totalorder %s28_s24, %s28_s24 }
  0x1b   :  { %p433_p11 = scmp.ne.s32.totalorder %s28_s24, %s432_s4  ;;  %p438_p13 = scmp.lt.s32.totalorder %s432_s4, %s432_s4 }
  0x1d   :  { %p439_p0 = por %p438_p13, %p437_p12 }
  0x1f   :  { %p440_p1 = pnand %p439_p0, %p433_p11 }
  0x21   :  { %443 = shalt.err (!%p440_p1)
}
  0x22   :  { %33 = dma.hbm_to_vmem [thread:$0]  %s535_s1, 1024, %s28_s24, [#allocation6], %s473_s19, %s473_s19, %s474_s20  }
  0x23   :  { %466 = dma.done.wait [#allocation3], 192  }
  0x24   :  { %467 = vsyncadd [#allocation3], 4294967104 }
  0x25   :  { %468 = dma.done.wait [#allocation6], 1024  }
  0x26   :  { %469 = vsyncadd [#allocation6], 4294966272  ;;  %v376_v0 = vld [vmem:[#allocation5] sm:$0xff]   ;;  %v377_v1 = vld [vmem:[#allocation5 + $0x8] sm:$0xff]   ;;  %v169_v10 = vlaneseq  ;;  %vm179_vm1 = vcmask 1043456   ;;  %v476_v36 = vmov 0.0|0.0  }
  0x27   :  { %336 = vmatprep.subr.bf16.mxu0 %v376_v0  ;;  %v378_v2 = vld [vmem:[#allocation5 + $0x10] sm:$0xff]   ;;  %v379_v3 = vld [vmem:[#allocation5 + $0x18] sm:$0xff]   ;;  %v380_v5 = vld [vmem:[#allocation5 + $0x20] sm:$0xff]   ;;  %365 = vmatprep.subr.bf16.mxu1 %v476_v36  ;;  %vm477_vm2 = vmmov 0   ;;  %v478_v37 = vmov 0.0   ;;  %vm214_vm6 = vcmask 162816  }
  0x28   :  { %337 = vmatpush3.bf16.msra.mxu0 %v376_v0  ;;  %v384_v4 = vld [vmem:[#allocation2] sm:$0xff]   ;;  %v381_v6 = vld [vmem:[#allocation5 + $0x28] sm:$0xff]   ;;  %v385_v9 = vld [vmem:[#allocation2 + $0x8] ss:$0 sps:$4 sm:$0x33]   ;;  %v170_v11 = vand.u32 127, %v169_v10  ;;  %362 = vmatprep.mubr.msk.f32.mxu1 %vm477_vm2, %v478_v37 }
  0x29   :  { %338 = vmatprep.subr.bf16.mxu0 %v377_v1  ;;  %352 = vmatprep.mubr.bf16.mxu0 %v384_v4  ;;  %v382_v7 = vld [vmem:[#allocation5 + $0x30] sm:$0xff]   ;;  %v383_v8 = vld [vmem:[#allocation5 + $0x38] sm:$0xff]   ;;  %v206_v40 = vshrl.u32 %v169_v10, 7  ;;  %s479_s1 = smov [#allocation7]  }
  0x2a   :  { %vm171_vm0 = vcmp.lt.s32.totalorder %v170_v11, 16  ;;  %s300_s6 = sshll.u32 %s479_s1, 4  ;;  %s301_s6 = int_to_ptr.vmem [resolvable:$true] %s300_s6 }
  0x2b   :  { %v209_v42 = vadd.s32 1, %v206_v40  ;;  %v207_v43 = vmul.u32 10, %v206_v40  ;;  %s444_s7 = scalar_lea.vmem %s301_s6, 32  ;;  %p449_p3 = scmp.lt.s32.totalorder %s301_s6, %s301_s6 }
  0x2c   :  { %339 = vmatpush3.bf16.msra.mxu0 %v377_v1  ;;  %p445_p2 = scmp.ne.s32.totalorder %s301_s6, %s444_s7  ;;  %p450_p4 = scmp.lt.s32.totalorder %s444_s7, %s444_s7 }
  0x2d   :  { %340 = vmatprep.subr.bf16.mxu0 %v378_v2  ;;  %v210_v44 = vmul.u32 10, %v209_v42  ;;  %vm208_vm3 = vcmp.ge.s32.totalorder %v170_v11, %v207_v43 }
  0x2e   :  { %p451_p5 = por %p450_p4, %p449_p3 }
  0x2f   :  { %vm211_vm4 = vcmp.lt.s32.totalorder %v170_v11, %v210_v44 }
  0x30   :  { %341 = vmatpush3.bf16.msra.mxu0 %v378_v2  ;;  %vm212_vm5 = vmand %vm208_vm3, %vm211_vm4  ;;  %p452_p6 = pnand %p451_p5, %p445_p2 }
  0x31   :  { %342 = vmatprep.subr.bf16.mxu0 %v379_v3  ;;  %v213_v52 = vsel %vm212_vm5, 0.1, %v478_v37 }
  0x34   :  { %343 = vmatpush3.bf16.msra.mxu0 %v379_v3 }
  0x35   :  { %344 = vmatprep.subr.bf16.mxu0 %v380_v5 }
  0x38   :  { %345 = vmatpush3.bf16.msra.mxu0 %v380_v5 }
  0x39   :  { %346 = vmatprep.subr.bf16.mxu0 %v381_v6 }
  0x3c   :  { %347 = vmatpush3.bf16.msra.mxu0 %v381_v6 }
  0x3d   :  { %348 = vmatprep.subr.bf16.mxu0 %v382_v7 }
  0x40   :  { %349 = vmatpush3.bf16.msra.mxu0 %v382_v7 }
  0x41   :  { %350 = vmatprep.subr.bf16.mxu0 %v383_v8 }
  0x44   :  { %351 = vmatpush3.bf16.msra.mxu0 %v383_v8 }
  0x47   :  { %353 = vmatmul.mubr.bf16.vlgmr.msra.gmra.mrb[0].mxu0 %v385_v9 }
 0x11a   :  { %v354_v12 = vpop.f32.mrb[0].mxu0 }
 0x11b   :  { %v168_v13 = vmul.f32 16.006582, %v354_v12  ;;  %v152_v14 = vpop.f32.mrb[1].mxu0 }
 0x11c   :  { %v166_v15 = vmul.f32 16.006582, %v152_v14  ;;  %v355_v16 = vpop.f32.mrb[2].mxu0 }
 0x11d   :  { %v155_v17 = vpop.f32.mrb[3].mxu0  ;;  %v174_v18 = vsel %vm171_vm0, %v168_v13, -1e+30 }
 0x11e   :  { %v167_v19 = vmul.f32 16.006582, %v155_v17  ;;  %v180_v20 = vsel %vm179_vm1, %v174_v18, -inf  ;;  %v172_v21 = vsel %vm171_vm0, %v166_v15, -1e+30 }
 0x11f   :  { %181 = vmax.xlane.f32.xlu1 %v180_v20  ;;  %175 = vmax.xlane.f32.xlu0 %v172_v21 }
 0x120   :  { %v173_v22 = vsel %vm171_vm0, %v167_v19, -1e+30 }
 0x123   :  { %177 = vmax.xlane.f32.xlu0 %v173_v22 }
 0x1ac   :  { %v182_v23 = vpop.xlane.xlu1 %181  ;;  %v176_v24 = vpop.xlane.xlu0 %175 }
 0x1ad   :  { %v185_v25 = vsub.f32 %v174_v18, %v182_v23  ;;  %v183_v26 = vsub.f32 %v172_v21, %v176_v24 }
 0x1af   :  { %v190_v27 = vmul.f32 1.442695, %v185_v25  ;;  %v186_v28 = vmul.f32 1.442695, %v183_v26 }
 0x1b0   :  { %v178_v29 = vpop.xlane.xlu0 %177 }
 0x1b1   :  { %v184_v30 = vsub.f32 %v173_v22, %v178_v29  ;;  %386 = vpow2.f32 %v186_v28 }
 0x1b2   :  { %388 = vpow2.f32 %v190_v27 }
 0x1b3   :  { %v188_v31 = vmul.f32 1.442695, %v184_v30 }
 0x1b5   :  { %390 = vpow2.f32 %v188_v31 }
 0x1bb   :  { %v387_v32 = vpop.eup %386 }
 0x1bc   :  { %v389_v33 = vpop.eup %388  ;;  %192 = vadd.xlane.f32.xlu1 %v387_v32 }
 0x1bd   :  { %v196_v35 = vsel %vm179_vm1, %v389_v33, 0.0 }
 0x1bf   :  { %v391_v34 = vpop.eup %390 }
 0x1c0   :  { %194 = vadd.xlane.f32.xlu0 %v391_v34  ;;  %197 = vadd.xlane.f32.xlu1 %v196_v35 }
 0x249   :  { %v193_v38 = vpop.xlane.xlu1 %192 }
 0x24a   :  { %392 = vrcp.f32 %v193_v38 }
 0x24d   :  { %v195_v39 = vpop.xlane.xlu0 %194  ;;  %v198_v41 = vpop.xlane.xlu1 %197 }
 0x24e   :  { %394 = vrcp.f32 %v195_v39 }
 0x24f   :  { %396 = vrcp.f32 %v198_v41 }
 0x254   :  { %v393_v45 = vpop.eup %392 }
 0x255   :  { %v200_v47 = vmul.f32 %v393_v45, %v387_v32 }
 0x258   :  { %v395_v46 = vpop.eup %394 }
 0x259   :  { %v202_v48 = vmul.f32 %v395_v46, %v391_v34  ;;  %v397_v50 = vpop.eup %396 }
 0x25a   :  { %v204_v51 = vmul.f32 %v397_v50, %v389_v33 }
 0x25b   :  { %v366_v49 = vpack.c.bf16 %v202_v48, %v200_v47 }
 0x25d   :  { %367 = vmatpush3.bf16.msra.mxu1 %v366_v49 }
 0x25e   :  { %360 = vmatprep.subr.mxu1 %v478_v37 }
 0x261   :  { %361 = vmatpush3.msk.msra.mxu1 %vm179_vm1, %v204_v51 }
 0x262   :  { %363 = vmatmul.mubr.msk.f32.vlgmr.msra.gmra.mrb[0].mxu1 %vm214_vm6, %v213_v52 }
 0x335   :  { %v287_v53 = vpop.f32.mrb[0].mxu1 }
 0x336   :  { %398 = vlog2.f32 %v287_v53  ;;  %v364_v54 = vpop.f32.mrb[1].mxu1 }
 0x340   :  { %v399_v55 = vpop.eup %398 }
 0x341   :  { %v292_v56 = vmul.f32 0.6931472, %v399_v55 }
 0x343   :  { %293 = vst [vmem:[#allocation7] sm:$0x3] %v292_v56 }
 0x344   :  { %455 = shalt.err (!%p452_p6)
}
 0x345   :  { %s456_s10 = scalar_lea.hbm %s536_s2, 32 }
 0x346   :  { %p457_p7 = scmp.ne.s32.totalorder %s536_s2, %s456_s10  ;;  %p460_p8 = scmp.lt.u32.totalorder %s456_s10, %s536_s2 }
 0x348   :  { %p462_p9 = pnand %p460_p8, %p457_p7 }
 0x34a   :  { %465 = shalt.err (!%p462_p9)
}
 0x34b   :  { %303 = dma.vmem_to_hbm [thread:$0]  %s301_s6, 32, %s536_s2, [#allocation4]  }
 0x34c   :  { %470 = dma.done.wait [#allocation4], 32  }
 0x34d   :  { %471 = vsyncadd [#allocation4], 4294967264 }
 0x34e   :  { %307 = vsyncpa [#allocation3], 1 }
 0x34f   :  { %308 = vsyncpa [#allocation6], 1 }
 0x350   :  { %309 = vsyncpa [#allocation4], 1 }

</bundles_post_ra>
